<compile_context>
chip_gen: v6e
topology: v6e:2x2x1
jax: 0.10.0
libtpu: 0.0.40
codegen_flags: <defaults>
</compile_context>

<pallas_src>
import jax
import jax.numpy as jnp
from jax.experimental import pallas as pl
from jax.experimental.pallas import tpu as pltpu

_MIB = 1024 * 1024


def _ffn_kernel(x_ref, wg_ref, wu_ref, bg_ref, bu_ref, w2_ref, b2_ref,
                o_ref, acc_ref):
    # x_ref : (tm, E)    wg_ref/wu_ref : (E, tf)   bg_ref/bu_ref : (1, tf)
    # w2_ref: (tf, E)    b2_ref        : (1, E)
    # o_ref : (tm, E)    acc_ref       : (tm, E) f32 scratch
    k = pl.program_id(1)

    @pl.when(k == 0)
    def _init():
        acc_ref[...] = jnp.zeros_like(acc_ref)

    x = x_ref[...]  # native dtype -> MXU fast path, f32 accumulation

    # Linear 1 (gate / up halves of W1) for this F-tile.
    a = jnp.dot(x, wg_ref[...], preferred_element_type=jnp.float32)
    a = a + bg_ref[...].astype(jnp.float32)
    g = jnp.dot(x, wu_ref[...], preferred_element_type=jnp.float32)
    g = g + bu_ref[...].astype(jnp.float32)

    # SwiGLU activation in f32, cast back to weight dtype for the MXU.
    s = (a * jax.nn.sigmoid(a) * g).astype(w2_ref.dtype)

    # Partial Linear 2: accumulate over the F (hidden) reduction axis.
    acc_ref[...] += jnp.dot(s, w2_ref[...], preferred_element_type=jnp.float32)

    @pl.when(k == pl.num_programs(1) - 1)
    def _finalize():
        y = acc_ref[...] + b2_ref[...].astype(jnp.float32)
        o_ref[...] = y.astype(o_ref.dtype)


def _round_up(a, b):
    return ((a + b - 1) // b) * b


def _tpu_vmem_capacity():
    try:
        info = pltpu.get_tpu_info()
        cap = int(getattr(info, "vmem_capacity_bytes", 0))
        if cap > 0:
            return cap
    except Exception:
        pass
    return 64 * _MIB  # conservative default (v7x-sized)


def _select_config(M, E, F, itemsize):
    """Generation-aware (tm, tf, vmem_limit) selection."""
    vmem_cap = _tpu_vmem_capacity()
    # Leave headroom for Mosaic internal scratch.
    vmem_limit = max(32 * _MIB, min(vmem_cap - 16 * _MIB, (vmem_cap * 85) // 100))
    budget = (vmem_limit * 9) // 10
    # 64 MiB VMEM => v7x-class TensorCore (two cores share the chip / HBM).
    two_cores = vmem_cap < 100 * _MIB

    packing = 8 * max(1, 4 // max(1, itemsize))  # 8 f32 / 16 bf16 / 32 int8
    m_aligned = _round_up(M, packing)

    # Hidden (reduction) tile: lane-aligned multiples of 128 dividing F.
    tf_cands = [c for c in (512, 256, 128) if F % c == 0] or [F]

    # Row tile: target the HBM/MXU roofline crossover (~512-1024 rows on
    # 128-MiB chips, ~512 on v7x); on v7x also keep grid[0] >= 2 so both
    # TensorCores get a share of the "parallel" axis.
    tm_cap = m_aligned
    if two_cores and m_aligned >= 2 * packing:
        tm_cap = min(tm_cap, _round_up(pl.cdiv(m_aligned, 2), packing))
    tm_targets = (512, 256, 128) if two_cores else (1024, 512, 256, 128)
    tm_cands = []
    for t in tm_targets + (packing,):
        t = max(packing, min(t, tm_cap))
        t = (t // packing) * packing
        if t not in tm_cands:
            tm_cands.append(t)
    tm_cands.sort(reverse=True)

    def vmem_bytes(tm, tf):
        dbl = 2 * itemsize * (2 * tm * E + 3 * E * tf + 2 * tf + E)
        return dbl + 4 * tm * E  # double-buffered I/O + f32 accumulator

    tm, tf = tm_cands[-1], tf_cands[-1]
    done = False
    for t in tm_cands:
        for f in tf_cands:
            if vmem_bytes(t, f) <= budget:
                tm, tf = t, f
                done = True
                break
        if done:
            break

    # Prefer a tm that divides the (sublane-aligned) row count so the jnp.pad
    # copy of x can be skipped; only accept divisors >= tm/2.
    if m_aligned % tm != 0:
        d = tm
        while d >= max(packing, tm // 2):
            if m_aligned % d == 0:
                tm = d
                break
            d -= packing

    return tm, tf, int(vmem_limit)


def feed_forward(x, w1, b1, w2, b2):
    """x: (B, S, E); w1: (E, 2F); b1: (2F,); w2: (F, E); b2: (E,)."""
    B, S, E = x.shape
    two_f = w1.shape[1]
    F = two_f // 2
    M = B * S
    itemsize = jnp.dtype(x.dtype).itemsize

    tm, tf, vmem_limit = _select_config(M, E, F, itemsize)
    kt = F // tf

    x2d = x.reshape(M, E)
    m_pad = pl.cdiv(M, tm) * tm
    if m_pad != M:
        # Only hit when no good row-tile divisor exists; zero-pad keeps the
        # extra rows benign through sigmoid/exp.
        x2d = jnp.pad(x2d, ((0, m_pad - M), (0, 0)))

    b2_2d = b2.reshape(1, E)
    grid = (m_pad // tm, kt)

    # Gate/up halves of W1/b1: when the hidden tile is lane-aligned we pass
    # the *original* fused buffers twice and address the two halves directly
    # via the index_maps (no wrapper-side W1 slice copies in HBM).
    if tf % 128 == 0:
        wg_arr, wu_arr = w1, w1
        bg_arr, bu_arr = b1.reshape(1, two_f), b1.reshape(1, two_f)
        gate_idx = lambda i, k: (0, k)
        up_idx = lambda i, k, _kt=kt: (0, k + _kt)
    else:
        # Small-F fallback (e.g. unit tests): split in the wrapper so block
        # lane dims equal the full array dims.
        wg_arr, wu_arr = w1[:, :F], w1[:, F:]
        bg_arr, bu_arr = b1[:F].reshape(1, F), b1[F:].reshape(1, F)
        gate_idx = lambda i, k: (0, k)
        up_idx = lambda i, k: (0, k)

    in_specs = [
        pl.BlockSpec((tm, E), lambda i, k: (i, 0)),    # x row tile (k-resident)
        pl.BlockSpec((E, tf), gate_idx),               # W1 gate half, F-tile
        pl.BlockSpec((E, tf), up_idx),                 # W1 up half,   F-tile
        pl.BlockSpec((1, tf), gate_idx),               # b1 gate half
        pl.BlockSpec((1, tf), up_idx),                 # b1 up half
        pl.BlockSpec((tf, E), lambda i, k: (k, 0)),    # W2 F-tile
        pl.BlockSpec((1, E), lambda i, k: (0, 0)),     # b2 (resident)
    ]
    out_specs = pl.BlockSpec((tm, E), lambda i, k: (i, 0))

    # Cost estimate: weights are re-streamed once per row tile.
    row_tiles = grid[0]
    flops = 2 * m_pad * E * (2 * F) + 2 * m_pad * F * E
    bytes_accessed = itemsize * (2 * m_pad * E
                                 + row_tiles * (E * 2 * F + 2 * F + F * E + E))
    cost = pl.CostEstimate(flops=flops, transcendentals=m_pad * F,
                           bytes_accessed=bytes_accessed)

    out2d = pl.pallas_call(
        _ffn_kernel,
        out_shape=jax.ShapeDtypeStruct((m_pad, E), x.dtype),
        grid_spec=pltpu.PrefetchScalarGridSpec(
            num_scalar_prefetch=0,
            grid=grid,
            in_specs=in_specs,
            out_specs=out_specs,
            scratch_shapes=[pltpu.VMEM((tm, E), jnp.float32)],
        ),
        compiler_params=pltpu.CompilerParams(
            dimension_semantics=("parallel", "arbitrary"),
            vmem_limit_bytes=vmem_limit,
        ),
        cost_estimate=cost,
    )(x2d, wg_arr, wu_arr, bg_arr, bu_arr, w2, b2_2d)

    return out2d[:M].reshape(B, S, E)


def reference(x, w1, b1, w2, b2):
    """Pure-JAX reference matching the PyTorch forward (eval mode)."""
    ffn_dim = w1.shape[1] // 2
    h = x @ w1 + b1
    a, g = h[..., :ffn_dim], h[..., ffn_dim:]
    s = a * jax.nn.sigmoid(a) * g
    return s @ w2 + b2


if __name__ == "__main__":
    # Small shapes consistent with the module: (B, S, E) with hidden ffn_dim.
    B, S, E, F = 2, 8, 32, 64

    key = jax.random.PRNGKey(0)
    kx, k1, k2, k3, k4 = jax.random.split(key, 5)

    x = jax.random.normal(kx, (B, S, E), dtype=jnp.float32)

    # Parameters stored as (in, out): nn.Linear(E, 2F), nn.Linear(F, E).
    w1 = jax.random.normal(k1, (E, 2 * F), dtype=jnp.float32) * 0.02
    b1 = jax.random.normal(k2, (2 * F,), dtype=jnp.float32) * 0.02
    w2 = jax.random.normal(k3, (F, E), dtype=jnp.float32) * 0.02
    b2 = jax.random.normal(k4, (E,), dtype=jnp.float32) * 0.02

    out = feed_forward(x, w1, b1, w2, b2)
    out = jax.block_until_ready(out)

    ref = reference(x, w1, b1, w2, b2)
    assert out.shape == (B, S, E)
    assert jnp.allclose(out, ref, atol=1e-5, rtol=1e-5), "mismatch vs reference"

    print("KERNEL_OK")
</pallas_src>

<mosaic_0001>
module attributes {stable_mosaic.version = 11 : i64} {
  func.func @_ffn_kernel(%arg0: i32, %arg1: i32, %arg2: memref<8x32xf32, #tpu.memory_space<vmem>>, %arg3: memref<32x64xf32, #tpu.memory_space<vmem>>, %arg4: memref<32x64xf32, #tpu.memory_space<vmem>>, %arg5: memref<1x64xf32, #tpu.memory_space<vmem>>, %arg6: memref<1x64xf32, #tpu.memory_space<vmem>>, %arg7: memref<64x32xf32, #tpu.memory_space<vmem>>, %arg8: memref<1x32xf32, #tpu.memory_space<vmem>>, %arg9: memref<8x32xf32, #tpu.memory_space<vmem>>, %arg10: memref<8x32xf32, #tpu.memory_space<vmem>>) attributes {dimension_semantics = [#tpu.dimension_semantics<parallel>, #tpu.dimension_semantics<arbitrary>], iteration_bounds = array<i64: 2, 1>, scalar_prefetch = 0 : i64, scratch_operands = 1 : i64, tpu.core_type = #tpu.core_type<tc>, window_params = [{transform_indices = @transform_0, window_bounds = array<i64: 8, 32>}, {transform_indices = @transform_1, window_bounds = array<i64: 32, 64>}, {transform_indices = @transform_2, window_bounds = array<i64: 32, 64>}, {transform_indices = @transform_3, window_bounds = array<i64: 1, 64>}, {transform_indices = @transform_4, window_bounds = array<i64: 1, 64>}, {transform_indices = @transform_5, window_bounds = array<i64: 64, 32>}, {pipeline_mode = #tpu.pipeline_mode<synchronous>, transform_indices = @transform_6, window_bounds = array<i64: 1, 32>}, {transform_indices = @transform_7, window_bounds = array<i64: 8, 32>}]} {
    %c0_i32 = arith.constant 0 : i32
    %0 = arith.cmpi eq, %arg1, %c0_i32 : i32
    %1 = arith.extui %0 : i1 to i32
    %c0_i32_0 = arith.constant 0 : i32
    %2 = arith.cmpi ne, %1, %c0_i32_0 : i32
    scf.if %2 {
      %cst_21 = arith.constant 0.000000e+00 : f32
      %29 = vector.broadcast %cst_21 : f32 to vector<8x32xf32>
      %c0_22 = arith.constant 0 : index
      %c0_23 = arith.constant 0 : index
      %30 = vector.load %arg10[%c0_22, %c0_23] : memref<8x32xf32, #tpu.memory_space<vmem>>, vector<8x32xf32>
      tpu.vector_store %arg10[%c0_22, %c0_23], %29 {strides = array<i32>} : memref<8x32xf32, #tpu.memory_space<vmem>>, vector<8x32xf32>,
    } else {
    }
    %c0 = arith.constant 0 : index
    %c0_1 = arith.constant 0 : index
    %3 = vector.load %arg2[%c0, %c0_1] : memref<8x32xf32, #tpu.memory_space<vmem>>, vector<8x32xf32>
    %c0_2 = arith.constant 0 : index
    %c0_3 = arith.constant 0 : index
    %4 = vector.load %arg3[%c0_2, %c0_3] : memref<32x64xf32, #tpu.memory_space<vmem>>, vector<32x64xf32>
    %cst = arith.constant dense<0.000000e+00> : vector<8x64xf32>
    %5 = tpu.matmul %3, %4, %cst {dimension_numbers = #tpu.dot_dimension_numbers<[1], [0], [0], [1], [0, 0, 1, 1], [], []>} : vector<8x32xf32>, vector<32x64xf32>, vector<8x64xf32> -> vector<8x64xf32>
    %c0_4 = arith.constant 0 : index
    %c0_5 = arith.constant 0 : index
    %6 = vector.load %arg5[%c0_4, %c0_5] : memref<1x64xf32, #tpu.memory_space<vmem>>, vector<1x64xf32>
    %7 = vector.broadcast %6 : vector<1x64xf32> to vector<8x64xf32>
    %8 = arith.addf %5, %7 : vector<8x64xf32>
    %c0_6 = arith.constant 0 : index
    %c0_7 = arith.constant 0 : index
    %9 = vector.load %arg4[%c0_6, %c0_7] : memref<32x64xf32, #tpu.memory_space<vmem>>, vector<32x64xf32>
    %cst_8 = arith.constant dense<0.000000e+00> : vector<8x64xf32>
    %10 = tpu.matmul %3, %9, %cst_8 {dimension_numbers = #tpu.dot_dimension_numbers<[1], [0], [0], [1], [0, 0, 1, 1], [], []>} : vector<8x32xf32>, vector<32x64xf32>, vector<8x64xf32> -> vector<8x64xf32>
    %c0_9 = arith.constant 0 : index
    %c0_10 = arith.constant 0 : index
    %11 = vector.load %arg6[%c0_9, %c0_10] : memref<1x64xf32, #tpu.memory_space<vmem>>, vector<1x64xf32>
    %12 = vector.broadcast %11 : vector<1x64xf32> to vector<8x64xf32>
    %13 = arith.addf %10, %12 : vector<8x64xf32>
    %14 = arith.negf %8 : vector<8x64xf32>
    %15 = math.exp %14 : vector<8x64xf32>
    %cst_11 = arith.constant 1.000000e+00 : f32
    %16 = vector.broadcast %cst_11 : f32 to vector<8x64xf32>
    %17 = arith.addf %16, %15 : vector<8x64xf32>
    %18 = arith.divf %16, %17 : vector<8x64xf32>
    %19 = arith.mulf %8, %18 : vector<8x64xf32>
    %20 = arith.mulf %19, %13 : vector<8x64xf32>
    %c0_12 = arith.constant 0 : index
    %c0_13 = arith.constant 0 : index
    %21 = vector.load %arg10[%c0_12, %c0_13] : memref<8x32xf32, #tpu.memory_space<vmem>>, vector<8x32xf32>
    %c0_14 = arith.constant 0 : index
    %c0_15 = arith.constant 0 : index
    %22 = vector.load %arg7[%c0_14, %c0_15] : memref<64x32xf32, #tpu.memory_space<vmem>>, vector<64x32xf32>
    %cst_16 = arith.constant dense<0.000000e+00> : vector<8x32xf32>
    %23 = tpu.matmul %20, %22, %cst_16 {dimension_numbers = #tpu.dot_dimension_numbers<[1], [0], [0], [1], [0, 0, 1, 1], [], []>} : vector<8x64xf32>, vector<64x32xf32>, vector<8x32xf32> -> vector<8x32xf32>
    %24 = arith.addf %21, %23 : vector<8x32xf32>
    %c0_17 = arith.constant 0 : index
    %c0_18 = arith.constant 0 : index
    %25 = vector.load %arg10[%c0_17, %c0_18] : memref<8x32xf32, #tpu.memory_space<vmem>>, vector<8x32xf32>
    tpu.vector_store %arg10[%c0_17, %c0_18], %24 {strides = array<i32>} : memref<8x32xf32, #tpu.memory_space<vmem>>, vector<8x32xf32>,
    %c0_i32_19 = arith.constant 0 : i32
    %26 = arith.cmpi eq, %arg1, %c0_i32_19 : i32
    %27 = arith.extui %26 : i1 to i32
    %c0_i32_20 = arith.constant 0 : i32
    %28 = arith.cmpi ne, %27, %c0_i32_20 : i32
    scf.if %28 {
      %c0_21 = arith.constant 0 : index
      %c0_22 = arith.constant 0 : index
      %29 = vector.load %arg10[%c0_21, %c0_22] : memref<8x32xf32, #tpu.memory_space<vmem>>, vector<8x32xf32>
      %c0_23 = arith.constant 0 : index
      %c0_24 = arith.constant 0 : index
      %30 = vector.load %arg8[%c0_23, %c0_24] : memref<1x32xf32, #tpu.memory_space<vmem>>, vector<1x32xf32>
      %31 = vector.broadcast %30 : vector<1x32xf32> to vector<8x32xf32>
      %32 = arith.addf %29, %31 : vector<8x32xf32>
      %c0_25 = arith.constant 0 : index
      %c0_26 = arith.constant 0 : index
      %33 = vector.load %arg9[%c0_25, %c0_26] : memref<8x32xf32, #tpu.memory_space<vmem>>, vector<8x32xf32>
      tpu.vector_store %arg9[%c0_25, %c0_26], %32 {strides = array<i32>} : memref<8x32xf32, #tpu.memory_space<vmem>>, vector<8x32xf32>,
    } else {
    }
    return
  }
  func.func @transform_0(%arg0: i32, %arg1: i32) -> (i32, i32) {
    %c0_i32 = arith.constant 0 : i32
    %c0_i32_0 = arith.constant 0 : i32
    return %arg0, %c0_i32 : i32, i32
  }
  func.func @transform_1(%arg0: i32, %arg1: i32) -> (i32, i32) {
    %c0_i32 = arith.constant 0 : i32
    %c0_i32_0 = arith.constant 0 : i32
    return %c0_i32, %arg1 : i32, i32
  }
  func.func @transform_2(%arg0: i32, %arg1: i32) -> (i32, i32) {
    %c0_i32 = arith.constant 0 : i32
    %c0_i32_0 = arith.constant 0 : i32
    return %c0_i32, %arg1 : i32, i32
  }
  func.func @transform_3(%arg0: i32, %arg1: i32) -> (i32, i32) {
    %c0_i32 = arith.constant 0 : i32
    %c0_i32_0 = arith.constant 0 : i32
    return %c0_i32, %arg1 : i32, i32
  }
  func.func @transform_4(%arg0: i32, %arg1: i32) -> (i32, i32) {
    %c0_i32 = arith.constant 0 : i32
    %c0_i32_0 = arith.constant 0 : i32
    return %c0_i32, %arg1 : i32, i32
  }
  func.func @transform_5(%arg0: i32, %arg1: i32) -> (i32, i32) {
    %c0_i32 = arith.constant 0 : i32
    %c0_i32_0 = arith.constant 0 : i32
    return %arg1, %c0_i32 : i32, i32
  }
  func.func @transform_6(%arg0: i32, %arg1: i32) -> (i32, i32) {
    %c0_i32 = arith.constant 0 : i32
    %c0_i32_0 = arith.constant 0 : i32
    %c0_i32_1 = arith.constant 0 : i32
    return %c0_i32, %c0_i32_0 : i32, i32
  }
  func.func @transform_7(%arg0: i32, %arg1: i32) -> (i32, i32) {
    %c0_i32 = arith.constant 0 : i32
    %c0_i32_0 = arith.constant 0 : i32
    return %arg0, %c0_i32 : i32, i32
  }
}

</mosaic_0001>

<bundles_post_ra>
// kernel: tpu_custom_call.1
= control target key start
LH: loop header
LB: loop body
LE: loop exit
PB: predicated region body
PF: predicated region fallthrough
CT: control target
= control target key end

     0   :  { %12 = vsyncpa [#allocation4], 0  ;;  %s1228_s0 = inlined_call_operand.vmem [shape: f32[16,32], index: 0, kind: input, shape index: {}]   ;;  %s1229_s1 = inlined_call_operand.vmem [shape: f32[32,64], index: 1, kind: input, shape index: {}]   ;;  %s1230_s2 = inlined_call_operand.vmem [shape: f32[32,64], index: 2, kind: input, shape index: {}]   ;;  %s1231_s3 = inlined_call_operand.vmem [shape: f32[1,64], index: 3, kind: input, shape index: {}]   ;;  %s1232_s4 = inlined_call_operand.vmem [shape: f32[1,64], index: 4, kind: input, shape index: {}]   ;;  %s1233_s5 = inlined_call_operand.vmem [shape: f32[64,32], index: 5, kind: input, shape index: {}]   ;;  %s1234_s6 = inlined_call_operand.vmem [shape: f32[1,32], index: 6, kind: input, shape index: {}]   ;;  %s1235_s7 = inlined_call_operand.hbm [shape: f32[16,32], index: 7, kind: output, shape index: {}]  }
   0x1   :  { %14 = vsyncpa [#allocation4 + $0x1], 0  ;;  %s1064_s24 = smov 0   ;;  %s1066_s25 = smov 0  }
   0x2   :  { %s1068_s26 = smov 0   ;;  %s1070_s27 = smov 0  }
   0x3   :  { %s1072_s28 = smov 0   ;;  %s1074_s29 = smov 0  }
   0x4 LB: > { %s799_s30 = sadd.s32 4294967295, %s1019_s29   ;;  %s800_s8 = sadd.s32 4294967294, %s1019_s29   ;;  %s1019_s29 = sphi %s1074_s29, %s20_s29   ;;  %s1015_s28 = sphi %s1072_s28, %s1242_s28   ;;  %s1011_s27 = sphi %s1070_s27, %s1241_s27   ;;  %s1007_s26 = sphi %s1068_s26, %s1240_s26   ;;  %s1003_s25 = sphi %s1066_s25, %s1239_s25   ;;  %s999_s24 = sphi %s1064_s24, %s1238_s24  }
   0x5   : > { %s32_s9 = sadd.s32 1, %s1015_s28  ;;  %s216_s10 = sadd.s32 1, %s1007_s26 }
   0x6   : > { %p34_p0 = scmp.ge.s32.totalorder %s32_s9, 2  ;;  %p226_p1 = scmp.ne.s32.totalorder %s1007_s26, %s1003_s25 }
   0x7   : > { %p227_p2 = scmp.eq.s32.totalorder %s799_s30, 1  ;;  %p232_p3 = scmp.ne.s32.totalorder %s1003_s25, %s999_s24 }
   0x8   : > { %s1244_s9 = smov (%p34_p0, %s32_s9), 0  ;;  %p233_p5 = scmp.eq.s32.totalorder %s800_s8, 1 }
   0x9   : > { %p1104_p4 = por %p227_p2, %p226_p1  ;;  %s213_s12 = ssub.s32 %s1015_s28, %s1244_s9 }
   0xa   : > { %p808_p6 = scmp.ge.s32.totalorder %s1019_s29, 1  ;;  %p214_p7 = scmp.eq.s32.totalorder %s213_s12, 0 }
   0xb   : > { %p1111_p8 = por %p233_p5, %p232_p3  ;;  %p296_p9 = scmp.lt.s32.totalorder %s1019_s29, 3 }
   0xc   : > { %s1117_s14 = scalar_select %p214_p7, %s1007_s26, %s216_s10  }
   0xd   : > { %p297_p10 = pnand %p808_p6, %p296_p9 }
   0xe   : > { %p346_p11 = scmp.lt.s32.totalorder (!%p297_p10), %s1011_s27, 1  ;;  %s343_s17 = sand.u32 (!%p297_p10), 1, %s1003_s25  }
   0xf   : > { %300 = sbr.rel (%p297_p10) target bundleno = 478 (0x1de), region = 48  ;;  %s809_s18 = sshll.u32 (!%p297_p10), %s343_s17, 3 }
  0x10   : > { %s819_s21 = sshll.u32 (!%p297_p10), %s1011_s27, 7  ;;  %s1023_s16 = smov (!%p297_p10), [#allocation3]  }
  0x11   : > { %s661_s10 = scalar_lea.hbm (!%p297_p10), %s1235_s7, %s819_s21 }
  0x14   : > { %v380_v0 = vld [vmem:[%s1229_s1 + $0x18] sm:$0xff]  ;;  %v1021_v1 = vmov 0.0   ;;  %v379_v2 = vld [vmem:[%s1229_s1 + $0x10] sm:$0xff]  ;;  %vm1022_vm0 = vmmov 0   ;;  %vm374_vm1 = vcmask 261120   ;;  %s347_s19 = scalar_select %p346_p11, %s1011_s27, 1 }
  0x15   : > { %841 = vmatprep.subr.mxu1 %v1021_v1  ;;  %849 = vmatprep.mubr.msk.f32.mxu1 %vm1022_vm0, %v1021_v1  ;;  %375 = vst.msk [vmem:[#allocation2] sm:$0xff] %vm374_vm1, %v1021_v1  ;;  %v378_v3 = vld [vmem:[%s1229_s1 + $0x8] sm:$0xff]  ;;  %v377_v4 = vld [vmem:[%s1229_s1] sm:$0xff]  ;;  %v465_v6 = vld [vmem:[%s1230_s2 + $0x18] sm:$0xff]  ;;  %vm560_vm2 = vcmask 523264  }
  0x16   : > { %842 = vmatpush3.msra.mxu1 %v380_v0  ;;  %863 = vmatprep.subr.mxu0 %v1021_v1  ;;  %s810_s22 = sshll.u32 %s347_s19, 3  ;;  %v464_v7 = vld [vmem:[%s1230_s2 + $0x10] sm:$0xff]  ;;  %v463_v8 = vld [vmem:[%s1230_s2 + $0x8] sm:$0xff]  ;;  %v462_v9 = vld [vmem:[%s1230_s2] sm:$0xff]  ;;  %s947_s19 = sshll.u32 %s1023_s16, 4  ;;  %s948_s19 = int_to_ptr.vmem [resolvable:$false] %s947_s19 }
  0x17   : > { %843 = vmatprep.subr.mxu1 %v1021_v1  ;;  %879 = vmatprep.mubr.msk.f32.mxu0 %vm1022_vm0, %v1021_v1  ;;  %s349_s12 = scalar_lea.vmem %s1228_s0, %s810_s22  ;;  %v559_v10 = vld [vmem:[%s1233_s5 + $0x38] sm:$0xff]  ;;  %v558_v11 = vld [vmem:[%s1233_s5 + $0x30] sm:$0xff]  ;;  %v557_v12 = vld [vmem:[%s1233_s5 + $0x28] sm:$0xff]  ;;  %s345_s22 = scalar_lea.vmem [#allocation3], %s809_s18 }
  0x18   : > { %844 = vmatpush3.msra.mxu1 %v379_v2  ;;  %v376_v5 = vld [vmem:[%s349_s12] sm:$0xff]  ;;  %864 = vmatpush3.msra.mxu0 %v559_v10  ;;  %v555_v14 = vld [vmem:[%s1233_s5 + $0x18] sm:$0xff]  ;;  %v554_v15 = vld [vmem:[%s1233_s5 + $0x10] sm:$0xff]  ;;  %s663_s23 = sshll.u32 %s345_s22, 4  ;;  %s650_s12 = scalar_lea.sflag [#allocation4], %s343_s17  ;;  %s664_s23 = int_to_ptr.vmem [resolvable:$true] %s663_s23 }
  0x19   : > { %845 = vmatprep.subr.mxu1 %v1021_v1  ;;  %865 = vmatprep.subr.mxu0 %v1021_v1  ;;  %v556_v13 = vld [vmem:[%s1233_s5 + $0x20] sm:$0xff]  ;;  %v553_v16 = vld [vmem:[%s1233_s5 + $0x8] sm:$0xff]  ;;  %s943_s15 = scalar_lea.vmem %s664_s23, 128  ;;  %s949_s27 = scalar_lea.vmem %s948_s19, 256 }
  0x1a   : > { %846 = vmatpush3.msra.mxu1 %v378_v3  ;;  %866 = vmatpush3.msra.mxu0 %v558_v11  ;;  %v552_v17 = vld [vmem:[%s1233_s5] sm:$0xff]  ;;  %p944_p12 = scmp.ne.s32.totalorder %s664_s23, %s943_s15  ;;  %p950_p1 = scmp.lt.s32.totalorder %s664_s23, %s948_s19 }
  0x1b   : > { %847 = vmatprep.subr.mxu1 %v1021_v1  ;;  %867 = vmatprep.subr.mxu0 %v1021_v1  ;;  %v811_v18 = vld [vmem:[%s1231_s3] ss:$0 sm:$0xff]  ;;  %p951_p2 = scmp.lt.s32.totalorder %s949_s27, %s943_s15 }
  0x1c   : > { %848 = vmatpush3.msra.mxu1 %v377_v4  ;;  %868 = vmatpush3.msra.mxu0 %v557_v12  ;;  %v813_v27 = vld [vmem:[%s1232_s4] ss:$0 sm:$0xff]  ;;  %p945_p13 = pnand %p944_p12, %p1104_p4 }
  0x1d   : > { %850 = vmatmul.mubr.msk.f32.vlgmr.msra.gmra.mxu1 %vm374_vm1, %v376_v5  ;;  %852 = vmatprep.subr.mxu1 %v1021_v1  ;;  %v551_v32 = vld [vmem:[#allocation2] sm:$0xff]  ;;  %p952_p3 = por %p951_p2, %p950_p1 }
  0x1e   : > { %853 = vmatpush3.msra.mxu1 %v465_v6  ;;  %860 = vmatprep.mubr.msk.f32.mxu1 %vm1022_vm0, %v1021_v1  ;;  %v817_v36 = vld [vmem:[%s1234_s6] ss:$0 sm:$0xff]  ;;  %p946_p0 = pneg %p945_p13 }
  0x1f   : > { %854 = vmatprep.subr.mxu1 %v1021_v1  ;;  %869 = vmatprep.subr.mxu0 %v1021_v1 }
  0x20   : > { %855 = vmatpush3.msra.mxu1 %v464_v7  ;;  %870 = vmatpush3.msra.mxu0 %v556_v13  ;;  %p953_p5 = pnand %p952_p3, %p946_p0 }
  0x21   : > { %856 = vmatprep.subr.mxu1 %v1021_v1  ;;  %871 = vmatprep.subr.mxu0 %v1021_v1 }
  0x22   : > { %857 = vmatpush3.msra.mxu1 %v463_v8  ;;  %872 = vmatpush3.msra.mxu0 %v555_v14 }
  0x23   : > { %858 = vmatprep.subr.mxu1 %v1021_v1  ;;  %873 = vmatprep.subr.mxu0 %v1021_v1 }
  0x24   : > { %859 = vmatpush3.msra.mxu1 %v462_v9  ;;  %874 = vmatpush3.msra.mxu0 %v554_v15 }
  0x25   : > { %861 = vmatmul.mubr.msk.f32.vlgmr.msra.gmra.mxu1 %vm374_vm1, %v376_v5  ;;  %875 = vmatprep.subr.mxu0 %v1021_v1 }
  0x26   : > { %876 = vmatpush3.msra.mxu0 %v553_v16 }
  0x27   : > { %877 = vmatprep.subr.mxu0 %v1021_v1 }
  0x28   : > { %878 = vmatpush3.msra.mxu0 %v552_v17 }
  0xdd   : > { %v458_v19 = vpop.f32.mrf.mxu1 }
  0xde   : > { %v459_v20 = vadd.f32 %v811_v18, %v458_v19 }
  0xdf   : > { %v851_v21 = vpop.f32.mrf.mxu1 }
  0xe0   : > { %v815_v22 = vmul.f32 -1.442695, %v459_v20 }
  0xe2   : > { %939 = vpow2.f32 %v815_v22 }
  0xe5   : > { %v539_v23 = vpop.f32.mrf.mxu1 }
  0xe6   : > { %v540_v28 = vadd.f32 %v813_v27, %v539_v23 }
  0xe7   : > { %v862_v24 = vpop.f32.mrf.mxu1 }
  0xef   : > { %v940_v25 = vpop.eup %939 }
  0xf0   : > { %v546_v26 = vadd.f32 1.0, %v940_v25 }
  0xf2   : > { %941 = vrcp.f32 %v546_v26 }
  0xff   : > { %v942_v29 = vpop.eup %941 }
 0x100   : > { %v549_v30 = vmul.f32 %v942_v29, %v459_v20 }
 0x102   : > { %v550_v31 = vmul.f32 %v549_v30, %v540_v28 }
 0x104   : > { %880 = vmatmul.mubr.msk.f32.vlgmr.msra.gmra.mxu0 %vm560_vm2, %v550_v31 }
 0x1c4   : > { %v630_v33 = vpop.f32.mrf.mxu0 }
 0x1c5   : > { %v634_v34 = vadd.f32 %v630_v33, %v551_v32 }
 0x1c6   : > { %v881_v35 = vpop.f32.mrf.mxu0 }
 0x1c7   : > { %635 = vst.msk [vmem:[#allocation2] sm:$0xff] %vm374_vm1, %v634_v34 }
 0x1ce   : > { %v639_v37 = vld [vmem:[#allocation2] sm:$0xff] }
 0x1cf   : > { %v647_v38 = vadd.f32 %v817_v36, %v639_v37 }
 0x1d1   : > { %648 = vst.msk [vmem:[%s345_s22] sm:$0xff] %vm374_vm1, %v647_v38 }
 0x1d2   : > { %956 = shalt.err (!%p953_p5)
}
 0x1d3   : > { %s957_s18 = scalar_lea.hbm %s661_s10, 128  ;;  %s961_s21 = scalar_lea.hbm %s1235_s7, 256 }
 0x1d4   : > { %p958_p6 = scmp.ne.s32.totalorder %s661_s10, %s957_s18  ;;  %p962_p10 = scmp.lt.s32.totalorder %s661_s10, %s1235_s7 }
 0x1d5   : > { %p963_p11 = scmp.lt.s32.totalorder %s961_s21, %s957_s18 }
 0x1d6   : > { %p959_p7 = pnand %p958_p6, %p1104_p4 }
 0x1d7   : > { %p964_p12 = por %p963_p11, %p962_p10 }
 0x1d8   : > { %p960_p9 = pneg %p959_p7 }
 0x1da   : > { %p965_p13 = pnand %p964_p12, %p960_p9 }
 0x1dc   : > { %968 = shalt.err (!%p965_p13)
}
 0x1dd   : > { %882 = dma.vmem_to_hbm [thread:$0]  (%p1104_p4), %s664_s23, 128, %s661_s10, %s650_s12  }
 0x1de PF: > { %p888_p0 = scmp.ge.s32.totalorder %s1019_s29, 2  ;;  %s675_s8 = sand.u32 1, %s999_s24  }
 0x1df   : > { %s676_s15 = scalar_lea.sflag [#allocation4], %s675_s8 }
 0x1e0   : > { %p885_p1 = pnand %p888_p0, %p1111_p8 }
 0x1e2   : > { %p886_p2 = pneg %p885_p1 }
 0x1e4   : > { %994 = dma.done.wait (%p886_p2), %s676_s15, 128  }
 0x1e5   : > { %996 = vsyncadd (%p886_p2), %s676_s15, 4294967168  ;;  %s20_s29 = sadd.s32 1, %s1019_s29   ;;  %s1238_s24 = smov %s1003_s25 }
 0x1e6   : > { %p17_p3 = scmp.ge.s32.totalorder %s20_s29, 4   ;;  %s1239_s25 = smov %s1007_s26 }
 0x1e7   : > { %s1240_s26 = smov %s1117_s14  ;;  %s1241_s27 = smov %s1015_s28 }
 0x1e8   : > { %s1242_s28 = smov %s1244_s9  ;;  %19 = sbr.rel (!%p17_p3) target bundleno = 4 (0x4), region = 106 }
 0x1ed   :  { %681 = vsyncpa [#allocation4], 1 }
 0x1ee   :  { %683 = vsyncpa [#allocation4 + $0x1], 1 }

</bundles_post_ra>
